<compile_context>
chip_gen: v7x
topology: tpu7x:2x2x1
jax: 0.10.0
libtpu: 0.0.40
codegen_flags: <defaults>
</compile_context>

<pallas_src>
import jax
import jax.numpy as jnp
from jax.experimental import pallas as pl
from jax.experimental.pallas import tpu as pltpu


def nnmodel_kernel(xT_ref, w1_ref, b1_ref, w2_ref, b2_ref, wo_ref, bo_ref, o_ref):
    xT = xT_ref[...]                                                   # (D, TN)

    # --- feature_extractor: Linear(D,H) -> ReLU -> Linear(H,F), feature-major ---
    h = jnp.dot(w1_ref[...], xT, preferred_element_type=jnp.float32) + b1_ref[...]
    h = jnp.maximum(h, 0.0)                                            # (H, TN)
    f = jnp.dot(w2_ref[...], h.astype(w2_ref.dtype),
                preferred_element_type=jnp.float32) + b2_ref[...]
    # --- NNModel: relu(features) ---
    f = jnp.maximum(f, 0.0)                                            # (F, TN)

    # --- output_layer: Linear(F, 1) -> lane-dense (1, TN) row ---
    out = jnp.dot(wo_ref[...], f.astype(wo_ref.dtype),
                  preferred_element_type=jnp.float32) + bo_ref[...]
    o_ref[...] = out.astype(o_ref.dtype)                               # (1, TN)


def prepare_params(w1, b1, w2, b2, wo, bo, dtype=jnp.float32):
    """One-time prep of PyTorch-layout params.  No transposes are needed for the
    feature-major kernel (W @ xT uses the (out, in) layout directly).  Pass
    dtype=jnp.bfloat16 to run the matmul operands in bf16 (f32 accumulation)."""
    return (
        jnp.asarray(w1, dtype),                              # (H, D)
        jnp.asarray(b1, jnp.float32).reshape(-1, 1),         # (H, 1)
        jnp.asarray(w2, dtype),                              # (F, H)
        jnp.asarray(b2, jnp.float32).reshape(-1, 1),         # (F, 1)
        jnp.asarray(wo, dtype).reshape(1, -1),               # (1, F)
        jnp.asarray(bo, jnp.float32).reshape(1, 1),          # (1, 1)
    )


def prepare_input(x_nd, dtype=jnp.float32):
    """One-time (N, D) -> (D, N) feature-major transpose.  Do this where the
    batch is produced (parameter-load / data-pipeline time), not per step."""
    return jnp.asarray(x_nd, dtype).T


def _round_up(v, m):
    return ((v + m - 1) // m) * m


def nnmodel_forward(x_dn, params, *, block_rows=8192):
    """x_dn: feature-major input (D, N) from prepare_input().
    params: from prepare_params().  Returns (N, 1) float32 (module layout)."""
    w1, b1, w2, b2, wo, bo = params
    D, N = x_dn.shape
    H = w1.shape[0]
    F = w2.shape[0]

    if N <= 256:
        # Tiny batch: single full-extent block (launch-overhead bound anyway).
        tn = N
    else:
        # >= 2 lane-aligned blocks so "parallel" shards across v7x's 2 TCs;
        # cap at block_rows (multiple of 128) to stay well inside VMEM.
        tn = min(block_rows, _round_up(pl.cdiv(N, 2), 128))
    grid = (pl.cdiv(N, tn),)                    # no jnp.pad: edge block is masked

    flops = 2 * N * (D * H + H * F + F)
    bytes_accessed = 4 * (N * D + D * H + H + H * F + F + F + 1 + N)

    const = lambda i: (0, 0)                    # weights/biases: VMEM-resident
    out = pl.pallas_call(
        nnmodel_kernel,
        out_shape=jax.ShapeDtypeStruct((1, N), jnp.float32),
        grid=grid,
        in_specs=[
            pl.BlockSpec((D, tn), lambda i: (0, i)),   # xT: batch tiled on lanes
            pl.BlockSpec((H, D), const),               # w1 (PyTorch layout)
            pl.BlockSpec((H, 1), const),               # b1 column
            pl.BlockSpec((F, H), const),               # w2
            pl.BlockSpec((F, 1), const),               # b2 column
            pl.BlockSpec((1, F), const),               # wo row
            pl.BlockSpec((1, 1), const),               # bo
        ],
        out_specs=pl.BlockSpec((1, tn), lambda i: (0, i)),   # lane-dense output row
        compiler_params=pltpu.CompilerParams(
            dimension_semantics=("parallel",)),
        cost_estimate=pl.CostEstimate(
            flops=flops, transcendentals=0, bytes_accessed=bytes_accessed),
    )(x_dn, w1, b1, w2, b2, wo, bo)

    # Back to the module's (N, 1) output layout (cheap wrapper-side reshape).
    return out.reshape(N, 1)


def _torch_like_linear_init(key, out_features, in_features):
    """Deterministic init mimicking torch.nn.Linear defaults (uniform +-1/sqrt(fan_in))."""
    kw, kb = jax.random.split(key)
    bound = 1.0 / jnp.sqrt(jnp.float32(in_features))
    w = jax.random.uniform(kw, (out_features, in_features), jnp.float32, -bound, bound)
    b = jax.random.uniform(kb, (out_features,), jnp.float32, -bound, bound)
    return w, b


if __name__ == "__main__":
    # Small UCI-like shapes: batch=8, input dim=16, hidden=32, num_out_features=32.
    N, D, H, F = 8, 16, 32, 32

    root = jax.random.PRNGKey(0)
    kx, k1, k2, k3 = jax.random.split(root, 4)

    x_nd = jax.random.normal(kx, (N, D), jnp.float32)        # module-layout input

    # feature_extractor params (2-layer MLP) + output_layer params, PyTorch layout.
    w1, b1 = _torch_like_linear_init(k1, H, D)   # Linear(D, H)
    w2, b2 = _torch_like_linear_init(k2, F, H)   # Linear(H, F)  -> num_out_features
    wo, bo = _torch_like_linear_init(k3, 1, F)   # output_layer: Linear(F, 1)

    # One-time prep: no per-call transposes anywhere in the forward path.
    params = prepare_params(w1, b1, w2, b2, wo, bo)           # f32 validation path
    x_dn = prepare_input(x_nd)                                # (D, N) feature-major

    out = jax.block_until_ready(nnmodel_forward(x_dn, params))

    # Pure-JAX reference (same semantics as the PyTorch forward).
    # TODO(synk): `likelihood` is unused in NNModel.forward, so it is not translated.
    h_ref = jnp.maximum(x_nd @ w1.T + b1, 0.0)
    f_ref = h_ref @ w2.T + b2
    ref = jnp.maximum(f_ref, 0.0) @ wo.T + bo

    assert out.shape == (N, 1)
    assert jnp.allclose(out, ref, atol=1e-5, rtol=1e-5)
    print("KERNEL_OK")
</pallas_src>

<mosaic_0001>
module attributes {stable_mosaic.version = 11 : i64} {
  func.func @nnmodel_kernel(%arg0: i32, %arg1: memref<16x8xf32, #tpu.memory_space<vmem>>, %arg2: memref<32x16xf32, #tpu.memory_space<vmem>>, %arg3: memref<32x1xf32, #tpu.memory_space<vmem>>, %arg4: memref<32x32xf32, #tpu.memory_space<vmem>>, %arg5: memref<32x1xf32, #tpu.memory_space<vmem>>, %arg6: memref<1x32xf32, #tpu.memory_space<vmem>>, %arg7: memref<1x1xf32, #tpu.memory_space<vmem>>, %arg8: memref<1x8xf32, #tpu.memory_space<vmem>>) attributes {dimension_semantics = [#tpu.dimension_semantics<parallel>], iteration_bounds = array<i64: 1>, scalar_prefetch = 0 : i64, scratch_operands = 0 : i64, tpu.core_type = #tpu.core_type<tc>, window_params = [{transform_indices = @transform_0, window_bounds = array<i64: 16, 8>}, {pipeline_mode = #tpu.pipeline_mode<synchronous>, transform_indices = @transform_1, window_bounds = array<i64: 32, 16>}, {pipeline_mode = #tpu.pipeline_mode<synchronous>, transform_indices = @transform_2, window_bounds = array<i64: 32, 1>}, {pipeline_mode = #tpu.pipeline_mode<synchronous>, transform_indices = @transform_3, window_bounds = array<i64: 32, 32>}, {pipeline_mode = #tpu.pipeline_mode<synchronous>, transform_indices = @transform_4, window_bounds = array<i64: 32, 1>}, {pipeline_mode = #tpu.pipeline_mode<synchronous>, transform_indices = @transform_5, window_bounds = array<i64: 1, 32>}, {pipeline_mode = #tpu.pipeline_mode<synchronous>, transform_indices = @transform_6, window_bounds = array<i64: 1, 1>}, {transform_indices = @transform_7, window_bounds = array<i64: 1, 8>}]} {
    %c0 = arith.constant 0 : index
    %c0_0 = arith.constant 0 : index
    %0 = vector.load %arg1[%c0, %c0_0] : memref<16x8xf32, #tpu.memory_space<vmem>>, vector<16x8xf32>
    %c0_1 = arith.constant 0 : index
    %c0_2 = arith.constant 0 : index
    %1 = vector.load %arg2[%c0_1, %c0_2] : memref<32x16xf32, #tpu.memory_space<vmem>>, vector<32x16xf32>
    %cst = arith.constant dense<0.000000e+00> : vector<32x8xf32>
    %2 = tpu.matmul %1, %0, %cst {dimension_numbers = #tpu.dot_dimension_numbers<[1], [0], [0], [1], [0, 0, 1, 1], [], []>} : vector<32x16xf32>, vector<16x8xf32>, vector<32x8xf32> -> vector<32x8xf32>
    %c0_3 = arith.constant 0 : index
    %c0_4 = arith.constant 0 : index
    %3 = vector.load %arg3[%c0_3, %c0_4] : memref<32x1xf32, #tpu.memory_space<vmem>>, vector<32x1xf32>
    %4 = vector.broadcast %3 : vector<32x1xf32> to vector<32x8xf32>
    %5 = arith.addf %2, %4 : vector<32x8xf32>
    %cst_5 = arith.constant 0.000000e+00 : f32
    %6 = vector.broadcast %cst_5 : f32 to vector<32x8xf32>
    %7 = arith.maximumf %5, %6 : vector<32x8xf32>
    %c0_6 = arith.constant 0 : index
    %c0_7 = arith.constant 0 : index
    %8 = vector.load %arg4[%c0_6, %c0_7] : memref<32x32xf32, #tpu.memory_space<vmem>>, vector<32x32xf32>
    %cst_8 = arith.constant dense<0.000000e+00> : vector<32x8xf32>
    %9 = tpu.matmul %8, %7, %cst_8 {dimension_numbers = #tpu.dot_dimension_numbers<[1], [0], [0], [1], [0, 0, 1, 1], [], []>} : vector<32x32xf32>, vector<32x8xf32>, vector<32x8xf32> -> vector<32x8xf32>
    %c0_9 = arith.constant 0 : index
    %c0_10 = arith.constant 0 : index
    %10 = vector.load %arg5[%c0_9, %c0_10] : memref<32x1xf32, #tpu.memory_space<vmem>>, vector<32x1xf32>
    %11 = vector.broadcast %10 : vector<32x1xf32> to vector<32x8xf32>
    %12 = arith.addf %9, %11 : vector<32x8xf32>
    %cst_11 = arith.constant 0.000000e+00 : f32
    %13 = vector.broadcast %cst_11 : f32 to vector<32x8xf32>
    %14 = arith.maximumf %12, %13 : vector<32x8xf32>
    %c0_12 = arith.constant 0 : index
    %c0_13 = arith.constant 0 : index
    %15 = vector.load %arg6[%c0_12, %c0_13] : memref<1x32xf32, #tpu.memory_space<vmem>>, vector<1x32xf32>
    %cst_14 = arith.constant dense<0.000000e+00> : vector<1x8xf32>
    %16 = tpu.matmul %15, %14, %cst_14 {dimension_numbers = #tpu.dot_dimension_numbers<[1], [0], [0], [1], [0, 0, 1, 1], [], []>} : vector<1x32xf32>, vector<32x8xf32>, vector<1x8xf32> -> vector<1x8xf32>
    %c0_15 = arith.constant 0 : index
    %c0_16 = arith.constant 0 : index
    %17 = vector.load %arg7[%c0_15, %c0_16] : memref<1x1xf32, #tpu.memory_space<vmem>>, vector<1x1xf32>
    %18 = vector.broadcast %17 : vector<1x1xf32> to vector<1x8xf32>
    %19 = arith.addf %16, %18 : vector<1x8xf32>
    %c0_17 = arith.constant 0 : index
    %c0_18 = arith.constant 0 : index
    %20 = vector.load %arg8[%c0_17, %c0_18] : memref<1x8xf32, #tpu.memory_space<vmem>>, vector<1x8xf32>
    tpu.vector_store %arg8[%c0_17, %c0_18], %19 {strides = array<i32>} : memref<1x8xf32, #tpu.memory_space<vmem>>, vector<1x8xf32>,
    return
  }
  func.func @transform_0(%arg0: i32) -> (i32, i32) {
    %c0_i32 = arith.constant 0 : i32
    %c0_i32_0 = arith.constant 0 : i32
    return %c0_i32, %arg0 : i32, i32
  }
  func.func @transform_1(%arg0: i32) -> (i32, i32) {
    %c0_i32 = arith.constant 0 : i32
    %c0_i32_0 = arith.constant 0 : i32
    %c0_i32_1 = arith.constant 0 : i32
    return %c0_i32, %c0_i32_0 : i32, i32
  }
  func.func @transform_2(%arg0: i32) -> (i32, i32) {
    %c0_i32 = arith.constant 0 : i32
    %c0_i32_0 = arith.constant 0 : i32
    %c0_i32_1 = arith.constant 0 : i32
    return %c0_i32, %c0_i32_0 : i32, i32
  }
  func.func @transform_3(%arg0: i32) -> (i32, i32) {
    %c0_i32 = arith.constant 0 : i32
    %c0_i32_0 = arith.constant 0 : i32
    %c0_i32_1 = arith.constant 0 : i32
    return %c0_i32, %c0_i32_0 : i32, i32
  }
  func.func @transform_4(%arg0: i32) -> (i32, i32) {
    %c0_i32 = arith.constant 0 : i32
    %c0_i32_0 = arith.constant 0 : i32
    %c0_i32_1 = arith.constant 0 : i32
    return %c0_i32, %c0_i32_0 : i32, i32
  }
  func.func @transform_5(%arg0: i32) -> (i32, i32) {
    %c0_i32 = arith.constant 0 : i32
    %c0_i32_0 = arith.constant 0 : i32
    %c0_i32_1 = arith.constant 0 : i32
    return %c0_i32, %c0_i32_0 : i32, i32
  }
  func.func @transform_6(%arg0: i32) -> (i32, i32) {
    %c0_i32 = arith.constant 0 : i32
    %c0_i32_0 = arith.constant 0 : i32
    %c0_i32_1 = arith.constant 0 : i32
    return %c0_i32, %c0_i32_0 : i32, i32
  }
  func.func @transform_7(%arg0: i32) -> (i32, i32) {
    %c0_i32 = arith.constant 0 : i32
    %c0_i32_0 = arith.constant 0 : i32
    return %c0_i32, %arg0 : i32, i32
  }
}

</mosaic_0001>

<bundles_post_ra>
// kernel: tpu_custom_call.1
= control target key start
LH: loop header
LB: loop body
LE: loop exit
PB: predicated region body
PF: predicated region fallthrough
CT: control target
= control target key end

     0   :  { %s629_s0 = inlined_call_operand.vmem [shape: f32[16,8], index: 0, kind: input, shape index: {}]   ;;  %s630_s1 = inlined_call_operand.vmem [shape: f32[32,16], index: 1, kind: input, shape index: {}]   ;;  %s631_s2 = inlined_call_operand.vmem [shape: f32[32,1], index: 2, kind: input, shape index: {}]   ;;  %s632_s3 = inlined_call_operand.vmem [shape: f32[32,32], index: 3, kind: input, shape index: {}]   ;;  %s633_s4 = inlined_call_operand.vmem [shape: f32[32,1], index: 4, kind: input, shape index: {}]   ;;  %s634_s5 = inlined_call_operand.vmem [shape: f32[1,32], index: 5, kind: input, shape index: {}]   ;;  %s635_s6 = inlined_call_operand.<no memory space> [shape: f32[1,1], index: 6, kind: input, shape index: {}]   ;;  %s636_s7 = inlined_call_operand.hbm [shape: f32[1,8], index: 7, kind: output, shape index: {}]  }
   0x1   :  { %v12_v0 = vstv %s635_s6 }
   0x2   :  { %13 = vst [vmem:[#allocation2] sm:$0x1] %v12_v0 }
   0x3   :  { %v29_v1 = vld [vmem:[%s629_s0] sm:$0xff]  ;;  %v30_v2 = vld [vmem:[%s629_s0 + $0x8] sm:$0xff]  ;;  %vm59_vm0 = vcmask 130048   ;;  %v503_v5 = vmov 0   ;;  %v37_v7 = vld [vmem:[%s631_s2 + $0x10] sm:$0xff] }
   0x4   :  { %v31_v3 = vld [vmem:[%s630_s1] sm:$0xff]  ;;  %v454_v4 = vpack.c.bf16 %v30_v2, %v29_v1  ;;  %477 = vset.pattern.permute.xlu0 %v503_v5  ;;  %478 = vset.pattern.permute.xlu1 %v503_v5  ;;  %v32_v8 = vld [vmem:[%s630_s1 + $0x8] sm:$0xff]  ;;  %v33_v10 = vld [vmem:[%s630_s1 + $0x10] sm:$0xff] }
   0x5   :  { %423 = vmatprep.mubr.msk.f32.mxu0 %vm59_vm0, %v31_v3  ;;  %v35_v6 = vld [vmem:[%s631_s2] sm:$0xff]  ;;  %v36_v9 = vld [vmem:[%s631_s2 + $0x8] sm:$0xff]  ;;  %51 = vperm.xlu1 %478, %v37_v7   ;;  %v38_v11 = vld [vmem:[%s631_s2 + $0x18] sm:$0xff] }
   0x6   :  { %455 = vmatprep.subr.bf16.mxu0 %v454_v4  ;;  %41 = vperm.xlu0 %477, %v35_v6  }
   0x7   :  { %457 = vmatpush3.bf16.msra.mxu0 %v454_v4 }
   0x8   :  { %14 = vsyncpa [#allocation4], 0  ;;  %v34_v12 = vld [vmem:[%s630_s1 + $0x18] sm:$0xff]  ;;  %v165_v13 = vld [vmem:[%s633_s4] sm:$0xff]  ;;  %vm189_vm1 = vcmask 261120   ;;  %v504_v40 = vmov 0.0|0.0   ;;  %v298_v61 = vlaneseq }
   0x9   :  { %56 = vperm.xlu1 %478, %v38_v11   ;;  %v166_v14 = vld [vmem:[%s633_s4 + $0x8] sm:$0xff]  ;;  %v167_v15 = vld [vmem:[%s633_s4 + $0x10] sm:$0xff]  ;;  %v168_v16 = vld [vmem:[%s633_s4 + $0x18] sm:$0xff]  ;;  %466 = vmatprep.subr.bf16.mxu0 %v504_v40  ;;  %vm505_vm2 = vmmov 0   ;;  %v506_v41 = vmov 0.0   ;;  %s507_s11 = smov [#allocation3]  }
   0xa   :  { %424 = vmatmul.mubr.msk.f32.vlgmr.msra.gmra.mrb[0].mxu0 %vm59_vm0, %v32_v8  ;;  %46 = vperm.xlu0 %477, %v36_v9   ;;  %v292_v17 = vld [vmem:[#allocation2] sm:$0x1]  ;;  %v162_v37 = vld [vmem:[%s632_s3 + $0x8] sm:$0xff]  ;;  %v163_v38 = vld [vmem:[%s632_s3 + $0x10] sm:$0xff]  ;;  %v299_v62 = vshrl.u32 %v298_v61, 7  ;;  %s383_s0 = sshll.u32 %s507_s11, 4  ;;  %s384_s0 = int_to_ptr.vmem [resolvable:$true] %s383_s0 }
   0xb   :  { %426 = vmatprep.mubr.msk.f32.mxu0 %vm59_vm0, %v33_v10  ;;  %v161_v18 = vld [vmem:[%s632_s3] sm:$0xff]  ;;  %v164_v39 = vld [vmem:[%s632_s3 + $0x18] sm:$0xff]  ;;  %vm375_vm3 = vcmask 57344   ;;  %s479_s12 = scalar_lea.vmem %s384_s0, 16  ;;  %s483_s13 = scalar_lea.vmem %s384_s0, 32 }
   0xc   :  { %437 = vmatprep.mubr.msk.f32.mxu1 %vm189_vm1, %v161_v18  ;;  %v291_v60 = vld [vmem:[%s634_s5] sm:$0x1]  ;;  %v300_v63 = vsub.s32 0, %v299_v62  ;;  %p480_p0 = scmp.ne.s32.totalorder %s384_s0, %s479_s12  ;;  %p484_p1 = scmp.lt.s32.totalorder %s384_s0, %s384_s0 }
   0xd   :  { %176 = vperm.xlu1 %478, %v166_v14   ;;  %p485_p2 = scmp.lt.s32.totalorder %s483_s13, %s479_s12 }
   0xe   :  { %427 = vmatmul.mubr.msk.f32.gmra.mrb[2].mxu0 %vm59_vm0, %v34_v12  ;;  %171 = vperm.xlu0 %477, %v165_v13  }
   0xf   :  { %451 = vmatprep.mubr.msk.f32.mxu0 %vm505_vm2, %v506_v41  ;;  %p486_p3 = por %p485_p2, %p484_p1 }
  0x11   :  { %186 = vperm.xlu1 %478, %v168_v16   ;;  %p487_p4 = pnand %p486_p3, %p480_p0 }
  0x12   :  { %181 = vperm.xlu0 %477, %v167_v15  }
  0x16   :  { %295 = vperm.xlu0 %477, %v292_v17  }
  0x84   :  { %v52_v20 = vpop.permute.xlu1 %51 }
  0x85   :  { %v42_v19 = vpop.permute.xlu0 %41 }
  0x88   :  { %v57_v27 = vpop.permute.xlu1 %56 }
  0x89   :  { %v47_v21 = vpop.permute.xlu0 %46 }
  0x8c   :  { %v177_v42 = vpop.permute.xlu1 %176 }
  0x8d   :  { %v172_v43 = vpop.permute.xlu0 %171 }
  0x90   :  { %v187_v49 = vpop.permute.xlu1 %186 }
  0x91   :  { %v182_v52 = vpop.permute.xlu0 %181 }
  0x95   :  { %v296_v0 = vpop.permute.xlu0 %295 }
  0x96   :  { %v301_v1 = vrot.slane %v296_v0, %v300_v63 }
  0xdd   :  { %v425_v22 = vpop.f32.mrb[0].mxu0 }
  0xde   :  { %v144_v23 = vadd.f32 %v425_v22, %v47_v21  ;;  %v138_v24 = vpop.f32.mrb[1].mxu0 }
  0xdf   :  { %v139_v25 = vadd.f32 %v138_v24, %v42_v19 }
  0xe0   :  { %v158_v26 = vmax.f32 %v144_v23, 0.0 }
  0xe1   :  { %v157_v28 = vmax.f32 %v139_v25, 0.0  ;;  %v428_v29 = vpop.f32.mrb[2].mxu0 }
  0xe2   :  { %v154_v30 = vadd.f32 %v428_v29, %v57_v27  ;;  %v148_v31 = vpop.f32.mrb[3].mxu0 }
  0xe3   :  { %v149_v32 = vadd.f32 %v148_v31, %v52_v20  ;;  %v458_v33 = vpack.c.bf16 %v158_v26, %v157_v28 }
  0xe4   :  { %v160_v34 = vmax.f32 %v154_v30, 0.0 }
  0xe5   :  { %v159_v35 = vmax.f32 %v149_v32, 0.0  ;;  %459 = vmatprep.subr.bf16.mxu1 %v458_v33 }
  0xe6   :  { %461 = vmatpush3.bf16.msra.mxu1 %v458_v33 }
  0xe7   :  { %v462_v36 = vpack.c.bf16 %v160_v34, %v159_v35 }
  0xe9   :  { %463 = vmatprep.subr.bf16.mxu1 %v462_v36 }
  0xea   :  { %465 = vmatpush3.bf16.msra.mxu1 %v462_v36 }
  0xed   :  { %438 = vmatmul.mubr.msk.f32.vlgmr.msra.gmra.mrb[0].mxu1 %vm189_vm1, %v162_v37 }
  0xee   :  { %440 = vmatprep.mubr.msk.f32.mxu1 %vm189_vm1, %v163_v38 }
  0xf1   :  { %441 = vmatmul.mubr.msk.f32.gmra.mrb[2].mxu1 %vm189_vm1, %v164_v39 }
 0x1c0   :  { %v439_v44 = vpop.f32.mrb[0].mxu1 }
 0x1c1   :  { %v274_v45 = vadd.f32 %v439_v44, %v177_v42  ;;  %v268_v46 = vpop.f32.mrb[1].mxu1 }
 0x1c2   :  { %v269_v47 = vadd.f32 %v268_v46, %v172_v43 }
 0x1c3   :  { %v288_v48 = vmax.f32 %v274_v45, 0.0 }
 0x1c4   :  { %v287_v50 = vmax.f32 %v269_v47, 0.0  ;;  %v442_v51 = vpop.f32.mrb[2].mxu1 }
 0x1c5   :  { %v284_v53 = vadd.f32 %v442_v51, %v187_v49  ;;  %v278_v54 = vpop.f32.mrb[3].mxu1 }
 0x1c6   :  { %v467_v55 = vpack.c.bf16 %v288_v48, %v287_v50  ;;  %v279_v56 = vadd.f32 %v278_v54, %v182_v52 }
 0x1c7   :  { %v290_v57 = vmax.f32 %v284_v53, 0.0 }
 0x1c8   :  { %v289_v58 = vmax.f32 %v279_v56, 0.0  ;;  %468 = vmatpush3.bf16.msra.mxu0 %v467_v55 }
 0x1c9   :  { %469 = vmatprep.subr.bf16.mxu0 %v504_v40 }
 0x1ca   :  { %v470_v59 = vpack.c.bf16 %v290_v57, %v289_v58 }
 0x1cc   :  { %471 = vmatpush3.bf16.msra.mxu0 %v470_v59 }
 0x1cf   :  { %452 = vmatmul.mubr.msk.f32.vlgmr.msra.gmra.mrb[4].mxu0 %vm189_vm1, %v291_v60 }
 0x2a2   :  { %v371_v2 = vpop.f32.mrb[4].mxu0 }
 0x2a3   :  { %v372_v3 = vadd.f32 %v371_v2, %v301_v1  ;;  %v453_v4 = vpop.f32.mrb[5].mxu0 }
 0x2a5   :  { %376 = vst.msk [vmem:[#allocation3] sm:$0x1] %vm375_vm3, %v372_v3 }
 0x2a6   :  { %490 = shalt.err (!%p487_p4)
}
 0x2a7   :  { %s491_s15 = scalar_lea.hbm %s636_s7, 16 }
 0x2a8   :  { %p492_p5 = scmp.ne.s32.totalorder %s636_s7, %s491_s15  ;;  %p495_p6 = scmp.lt.u32.totalorder %s491_s15, %s636_s7 }
 0x2aa   :  { %p497_p7 = pnand %p495_p6, %p492_p5 }
 0x2ac   :  { %500 = shalt.err (!%p497_p7)
}
 0x2ad   :  { %386 = dma.vmem_to_hbm [thread:$0]  %s384_s0, 16, %s636_s7, [#allocation4]  }
 0x2ae   :  { %501 = dma.done.wait [#allocation4], 16  }
 0x2af   :  { %502 = vsyncadd [#allocation4], 4294967280 }
 0x2b0   :  { %390 = vsyncpa [#allocation4], 1 }

</bundles_post_ra>
